<compile_context>
chip_gen: v5e
topology: v5e:2x2
jax: 0.10.0
libtpu: 0.0.40
codegen_flags: <defaults>
</compile_context>

<pallas_src>
import functools

import jax
import jax.numpy as jnp
from jax.experimental import pallas as pl
from jax.experimental.pallas import tpu as pltpu

NEG_SLOPE = 0.01   # torch.nn.LeakyReLU default
LANE = 128


def _round_up(a, b):
    return (a + b - 1) // b * b


def _leaky(v):
    return jnp.where(v > 0, v, NEG_SLOPE * v)


def _bdot(a, b):
    """bf16 MXU matmul with f32 accumulation (elementwise math stays f32)."""
    return jnp.dot(a.astype(jnp.bfloat16), b.astype(jnp.bfloat16),
                   preferred_element_type=jnp.float32)


# ---------------------------------------------------------------------------
# Kernel 1: s = LeakyReLU(x @ Wm + bm)   (msg_snd), node-tiled, parallel.
# ---------------------------------------------------------------------------
def _msg_snd_kernel(x_ref, wm_ref, bm_ref, s_ref):
    s = _bdot(x_ref[...], wm_ref[...]) + bm_ref[...]
    s_ref[...] = _leaky(s).astype(s_ref.dtype)


# ---------------------------------------------------------------------------
# Kernel 2: scatter_mean(msg_snd(x)[row] * edge_attr, col) -> msg_rec -> GRU.
#           Grid = (node tiles [parallel], edge tiles [arbitrary reduction]).
# ---------------------------------------------------------------------------
def _agg_update_kernel(x_ref, s_ref, row_ref, col_ref, ea_ref, icnt_ref,
                       wr1_ref, wr2_ref, br_ref,
                       wir_ref, wiz_ref, win_ref,
                       whr_ref, whz_ref, whn_ref,
                       b_r_ref, b_z_ref, b_in_ref, b_hn_ref,
                       out_ref, acc_ref):
    i = pl.program_id(0)                       # node tile
    e = pl.program_id(1)                       # edge tile (reduction)
    tile_n = out_ref.shape[0]
    tile_e = row_ref.shape[0]
    n_pad = s_ref.shape[0]

    @pl.when(e == 0)
    def _():
        acc_ref[...] = jnp.zeros_like(acc_ref)

    # --- gather msg_snd(x)[row] for this edge tile (bf16 one-hot, exact) ---
    row = row_ref[...]                                             # [tE, 1]
    node_iota = jax.lax.broadcasted_iota(jnp.int32, (tile_e, n_pad), 1)
    oh_row = (node_iota == row).astype(jnp.bfloat16)               # [tE, Np]
    gathered = jnp.dot(oh_row, s_ref[...],
                       preferred_element_type=jnp.float32)         # [tE, Cp]
    msgs = gathered * ea_ref[...]              # * edge_attr.view(-1, 1)

    # --- scatter-add into the node rows owned by this node tile -----------
    col = col_ref[...]                                             # [1, tE]
    nid = i * tile_n + jax.lax.broadcasted_iota(
        jnp.int32, (tile_n, tile_e), 0)
    oh_col = (nid == col).astype(jnp.bfloat16)                     # [tN, tE]
    acc_ref[...] += jnp.dot(oh_col, msgs.astype(jnp.bfloat16),
                            preferred_element_type=jnp.float32)

    # --- last edge tile: finish scatter_mean, msg_rec, GRUCell -------------
    @pl.when(e == pl.num_programs(1) - 1)
    def _():
        x = x_ref[...]
        msg = acc_ref[...] * icnt_ref[...]     # scatter_mean (precomputed 1/cnt)
        # msg_rec(LeakyReLU) on concat([msg, x]) without a lane-axis concat.
        m = _leaky(_bdot(msg, wr1_ref[...]) + _bdot(x, wr2_ref[...])
                   + br_ref[...])
        # GRUCell(input=m, hidden=x), per-gate weights (no [*,3C] slicing).
        r = jax.nn.sigmoid(_bdot(m, wir_ref[...]) + _bdot(x, whr_ref[...])
                           + b_r_ref[...])
        z = jax.nn.sigmoid(_bdot(m, wiz_ref[...]) + _bdot(x, whz_ref[...])
                           + b_z_ref[...])
        n = jnp.tanh(_bdot(m, win_ref[...]) + b_in_ref[...]
                     + r * (_bdot(x, whn_ref[...]) + b_hn_ref[...]))
        out_ref[...] = (1.0 - z) * n + z * x


@functools.partial(jax.jit, static_argnums=(4,))
def node_model_forward(x, edge_index, edge_attr, params, out_channels):
    """Pads/tiles inputs and runs the two Pallas kernels."""
    f32, bf16, i32 = jnp.float32, jnp.bfloat16, jnp.int32
    N, F = x.shape
    if F > out_channels:
        raise ValueError("input channels > out_channels")
    C = out_channels
    E = edge_index.shape[1]

    Cp = _round_up(C, LANE)          # lane-dense channel width
    Mp = _round_up(2 * C, LANE)      # lane-dense msg_rec width

    tile_n = 256 if N >= 256 else _round_up(max(N, 8), 8)
    Np = _round_up(N, tile_n)
    tile_e = 512 if E >= 512 else _round_up(max(E, 8), 8)
    Ep = _round_up(E, tile_e)
    grid_n = Np // tile_n
    grid_e = Ep // tile_e

    # ---- pad node features (also covers torch _prepare_input zero pad) ----
    x_pad = jnp.zeros((Np, Cp), f32).at[:N, :F].set(x.astype(f32))

    row = edge_index[0].astype(i32)
    col = edge_index[1].astype(i32)
    row_p = jnp.zeros((Ep, 1), i32).at[:E, 0].set(row)
    col_p = jnp.full((1, Ep), -1, i32).at[0, :E].set(col)    # -1: never matches
    ea_p = jnp.zeros((Ep, 1), f32).at[:E, 0].set(edge_attr.astype(f32))

    # scatter_mean counts are pure index metadata: precompute 1/count so the
    # kernel only multiplies (no in-kernel cross-lane reduce / divide).
    counts = jnp.zeros((Np,), f32).at[col].add(1.0)
    inv_cnt = (1.0 / jnp.maximum(counts, 1.0)).reshape(Np, 1)

    # ---- pad + cast weights (zero padding keeps the math exact) -----------
    def pad_w(w, rows, cols):
        return jnp.zeros((rows, cols), f32).at[:w.shape[0], :w.shape[1]].set(
            w.astype(f32)).astype(bf16)

    def pad_b(b, cols):
        return jnp.zeros((1, cols), f32).at[0, :b.shape[0]].set(b.astype(f32))

    wm = pad_w(params["wm"], Cp, Cp)
    bm = pad_b(params["bm"], Cp)
    wr1 = pad_w(params["wr"][:C], Cp, Mp)       # msg half of msg_rec weight
    wr2 = pad_w(params["wr"][C:], Cp, Mp)       # x   half of msg_rec weight
    br = pad_b(params["br"], Mp)
    wir = pad_w(params["wir"], Mp, Cp)
    wiz = pad_w(params["wiz"], Mp, Cp)
    win = pad_w(params["win"], Mp, Cp)
    whr = pad_w(params["whr"], Cp, Cp)
    whz = pad_w(params["whz"], Cp, Cp)
    whn = pad_w(params["whn"], Cp, Cp)
    b_r = pad_b(params["bir"] + params["bhr"], Cp)
    b_z = pad_b(params["biz"] + params["bhz"], Cp)
    b_in = pad_b(params["bin"], Cp)
    b_hn = pad_b(params["bhn"], Cp)

    # ---------------- kernel 1: msg_snd over node tiles --------------------
    s = pl.pallas_call(
        _msg_snd_kernel,
        out_shape=jax.ShapeDtypeStruct((Np, Cp), bf16),
        grid_spec=pltpu.PrefetchScalarGridSpec(
            num_scalar_prefetch=0,
            grid=(grid_n,),
            in_specs=[
                pl.BlockSpec((tile_n, Cp), lambda i: (i, 0)),
                pl.BlockSpec((Cp, Cp), lambda i: (0, 0)),
                pl.BlockSpec((1, Cp), lambda i: (0, 0)),
            ],
            out_specs=pl.BlockSpec((tile_n, Cp), lambda i: (i, 0)),
        ),
        compiler_params=pltpu.CompilerParams(
            dimension_semantics=("parallel",)),
    )(x_pad, wm, bm)

    # ---------------- kernel 2: aggregate + GRU update ---------------------
    # TODO(synk): for very large N, replace the fully VMEM-resident `s` with a
    # manual DMA gather (memory_space=pl.ANY + pltpu.make_async_copy).
    est = (
        2 * Np * Cp * 2                                      # s (bf16, resident)
        + 2 * tile_n * Cp * 4 * 2                            # x tile + out tile
        + tile_n * Cp * 4                                    # accumulator
        + 2 * (2 * tile_e * LANE + 8 * tile_e + tile_n * LANE) * 4
        + 2 * (2 * Cp * Mp + 3 * Mp * Cp + 3 * Cp * Cp) * 2  # bf16 weights
        + 2 * (Mp + 4 * Cp) * 8 * 4                          # biases
    )
    vmem_limit = int(min(64 * 2 ** 20, max(16 * 2 ** 20, 4 * est)))

    flops = 2 * (grid_n * Ep * Np * Cp          # gather one-hot matmuls
                 + Np * Ep * Cp                 # scatter one-hot matmuls
                 + Np * Cp * Mp * 2             # msg_rec
                 + Np * Mp * Cp * 3             # GRU input-side gates
                 + Np * Cp * Cp * 3)            # GRU hidden-side gates
    cost = pl.CostEstimate(
        flops=flops,
        transcendentals=3 * Np * Cp,
        bytes_accessed=(Np * Cp * (4 + 2 + 4) + Ep * 12
                        + (2 * Cp * Mp + 3 * Mp * Cp + 3 * Cp * Cp) * 2))

    h_pad = pl.pallas_call(
        _agg_update_kernel,
        out_shape=jax.ShapeDtypeStruct((Np, Cp), f32),
        grid_spec=pltpu.PrefetchScalarGridSpec(
            num_scalar_prefetch=0,
            grid=(grid_n, grid_e),
            in_specs=[
                pl.BlockSpec((tile_n, Cp), lambda i, e: (i, 0)),   # x
                pl.BlockSpec((Np, Cp), lambda i, e: (0, 0)),       # s (resident)
                pl.BlockSpec((tile_e, 1), lambda i, e: (e, 0)),    # row
                pl.BlockSpec((1, tile_e), lambda i, e: (0, e)),    # col
                pl.BlockSpec((tile_e, 1), lambda i, e: (e, 0)),    # edge_attr
                pl.BlockSpec((tile_n, 1), lambda i, e: (i, 0)),    # 1/count
                pl.BlockSpec((Cp, Mp), lambda i, e: (0, 0)),       # wr1
                pl.BlockSpec((Cp, Mp), lambda i, e: (0, 0)),       # wr2
                pl.BlockSpec((1, Mp), lambda i, e: (0, 0)),        # br
                pl.BlockSpec((Mp, Cp), lambda i, e: (0, 0)),       # wir
                pl.BlockSpec((Mp, Cp), lambda i, e: (0, 0)),       # wiz
                pl.BlockSpec((Mp, Cp), lambda i, e: (0, 0)),       # win
                pl.BlockSpec((Cp, Cp), lambda i, e: (0, 0)),       # whr
                pl.BlockSpec((Cp, Cp), lambda i, e: (0, 0)),       # whz
                pl.BlockSpec((Cp, Cp), lambda i, e: (0, 0)),       # whn
                pl.BlockSpec((1, Cp), lambda i, e: (0, 0)),        # b_r
                pl.BlockSpec((1, Cp), lambda i, e: (0, 0)),        # b_z
                pl.BlockSpec((1, Cp), lambda i, e: (0, 0)),        # b_in
                pl.BlockSpec((1, Cp), lambda i, e: (0, 0)),        # b_hn
            ],
            out_specs=pl.BlockSpec((tile_n, Cp), lambda i, e: (i, 0)),
            scratch_shapes=[pltpu.VMEM((tile_n, Cp), f32)],
        ),
        compiler_params=pltpu.CompilerParams(
            dimension_semantics=("parallel", "arbitrary"),
            vmem_limit_bytes=vmem_limit),
        cost_estimate=cost,
        input_output_aliases={0: 0},   # GRU replaces the hidden state in place
    )(x_pad, s, row_p, col_p, ea_p, inv_cnt,
      wr1, wr2, br, wir, wiz, win, whr, whz, whn, b_r, b_z, b_in, b_hn)

    return h_pad[:N, :C]


def make_params(key, C):
    """Deterministic init mimicking PyTorch uniform(-1/sqrt(fan), 1/sqrt(fan)).
    Weights are stored transposed ([in, out]); GRU weights are per-gate."""
    ks = jax.random.split(key, 16)

    def u(k, shape, fan_in):
        b = 1.0 / jnp.sqrt(fan_in)
        return jax.random.uniform(k, shape, jnp.float32, -b, b)

    return {
        "wm": u(ks[0], (C, C), C), "bm": u(ks[1], (C,), C),
        "wr": u(ks[2], (2 * C, 2 * C), 2 * C), "br": u(ks[3], (2 * C,), 2 * C),
        "wir": u(ks[4], (2 * C, C), C), "wiz": u(ks[5], (2 * C, C), C),
        "win": u(ks[6], (2 * C, C), C),
        "whr": u(ks[7], (C, C), C), "whz": u(ks[8], (C, C), C),
        "whn": u(ks[9], (C, C), C),
        "bir": u(ks[10], (C,), C), "biz": u(ks[11], (C,), C),
        "bin": u(ks[12], (C,), C),
        "bhr": u(ks[13], (C,), C), "bhz": u(ks[14], (C,), C),
        "bhn": u(ks[15], (C,), C),
    }


def reference_forward(x, edge_index, edge_attr, params, C):
    """Pure-JAX reference of NodeModel.forward.  Mirrors the kernel's bf16
    MXU-input / f32-accumulation precision so the comparison is tight."""
    N, F = x.shape
    x = x.astype(jnp.float32)
    if F < C:
        x = jnp.concatenate([x, jnp.zeros((N, C - F), jnp.float32)], axis=1)
    row, col = edge_index[0], edge_index[1]

    s = _leaky(_bdot(x, params["wm"]) + params["bm"])
    s = s.astype(jnp.bfloat16).astype(jnp.float32)       # kernel keeps s in bf16
    msgs = s[row] * edge_attr.astype(jnp.float32)[:, None]
    msgs = msgs.astype(jnp.bfloat16).astype(jnp.float32)
    sums = jnp.zeros((N, C), jnp.float32).at[col].add(msgs)
    counts = jnp.zeros((N,), jnp.float32).at[col].add(1.0)
    msg = sums / jnp.maximum(counts, 1.0)[:, None]

    m = _leaky(_bdot(msg, params["wr"][:C]) + _bdot(x, params["wr"][C:])
               + params["br"])
    r = jax.nn.sigmoid(_bdot(m, params["wir"]) + _bdot(x, params["whr"])
                       + params["bir"] + params["bhr"])
    z = jax.nn.sigmoid(_bdot(m, params["wiz"]) + _bdot(x, params["whz"])
                       + params["biz"] + params["bhz"])
    n = jnp.tanh(_bdot(m, params["win"]) + params["bin"]
                 + r * (_bdot(x, params["whn"]) + params["bhn"]))
    return (1.0 - z) * n + z * x


if __name__ == "__main__":
    key = jax.random.PRNGKey(0)
    k_x, k_ei, k_ea, k_p = jax.random.split(key, 4)

    N = 8        # nodes
    F_IN = 16    # raw node feature dim (< out_channels -> zero-padded)
    C = 32       # out_channels
    E = 16       # edges

    x = jax.random.normal(k_x, (N, F_IN), jnp.float32)
    edge_index = jax.random.randint(k_ei, (2, E), 0, N, jnp.int32)
    edge_attr = jax.random.normal(k_ea, (E,), jnp.float32)
    params = make_params(k_p, C)

    out = node_model_forward(x, edge_index, edge_attr, params, C)
    out = jax.block_until_ready(out)

    ref = reference_forward(x, edge_index, edge_attr, params, C)
    assert out.shape == (N, C)
    err = float(jnp.max(jnp.abs(out - ref)))
    assert err < 5e-3, f"max abs err {err}"
    print("KERNEL_OK")
</pallas_src>

<mosaic_0001>
module attributes {stable_mosaic.version = 11 : i64} {
  func.func @_msg_snd_kernel(%arg0: i32, %arg1: memref<8x128xf32, #tpu.memory_space<vmem>>, %arg2: memref<128x128xbf16, #tpu.memory_space<vmem>>, %arg3: memref<1x128xf32, #tpu.memory_space<vmem>>, %arg4: memref<8x128xbf16, #tpu.memory_space<vmem>>) attributes {dimension_semantics = [#tpu.dimension_semantics<parallel>], iteration_bounds = array<i64: 1>, scalar_prefetch = 0 : i64, scratch_operands = 0 : i64, tpu.core_type = #tpu.core_type<tc>, window_params = [{transform_indices = @transform_0, window_bounds = array<i64: 8, 128>}, {pipeline_mode = #tpu.pipeline_mode<synchronous>, transform_indices = @transform_1, window_bounds = array<i64: 128, 128>}, {pipeline_mode = #tpu.pipeline_mode<synchronous>, transform_indices = @transform_2, window_bounds = array<i64: 1, 128>}, {transform_indices = @transform_3, window_bounds = array<i64: 8, 128>}]} {
    %c0 = arith.constant 0 : index
    %c0_0 = arith.constant 0 : index
    %0 = vector.load %arg1[%c0, %c0_0] : memref<8x128xf32, #tpu.memory_space<vmem>>, vector<8x128xf32>
    %c0_1 = arith.constant 0 : index
    %c0_2 = arith.constant 0 : index
    %1 = vector.load %arg2[%c0_1, %c0_2] : memref<128x128xbf16, #tpu.memory_space<vmem>>, vector<128x128xbf16>
    %2 = arith.truncf %0 : vector<8x128xf32> to vector<8x128xbf16>
    %cst = arith.constant dense<0.000000e+00> : vector<8x128xf32>
    %3 = tpu.matmul %2, %1, %cst {dimension_numbers = #tpu.dot_dimension_numbers<[1], [0], [0], [1], [0, 0, 1, 1], [], []>} : vector<8x128xbf16>, vector<128x128xbf16>, vector<8x128xf32> -> vector<8x128xf32>
    %c0_3 = arith.constant 0 : index
    %c0_4 = arith.constant 0 : index
    %4 = vector.load %arg3[%c0_3, %c0_4] : memref<1x128xf32, #tpu.memory_space<vmem>>, vector<1x128xf32>
    %5 = vector.broadcast %4 : vector<1x128xf32> to vector<8x128xf32>
    %6 = arith.addf %3, %5 : vector<8x128xf32>
    %cst_5 = arith.constant 0.000000e+00 : f32
    %7 = vector.broadcast %cst_5 : f32 to vector<8x128xf32>
    %8 = arith.cmpf ogt, %6, %7 : vector<8x128xf32>
    %cst_6 = arith.constant 0.00999999977 : f32
    %9 = vector.broadcast %cst_6 : f32 to vector<8x128xf32>
    %10 = arith.mulf %9, %6 : vector<8x128xf32>
    %11 = arith.select %8, %6, %10 : vector<8x128xi1>, vector<8x128xf32>
    %12 = arith.truncf %11 : vector<8x128xf32> to vector<8x128xbf16>
    %c0_7 = arith.constant 0 : index
    %c0_8 = arith.constant 0 : index
    %13 = vector.load %arg4[%c0_7, %c0_8] : memref<8x128xbf16, #tpu.memory_space<vmem>>, vector<8x128xbf16>
    tpu.vector_store %arg4[%c0_7, %c0_8], %12 {strides = array<i32>} : memref<8x128xbf16, #tpu.memory_space<vmem>>, vector<8x128xbf16>,
    return
  }
  func.func @transform_0(%arg0: i32) -> (i32, i32) {
    %c0_i32 = arith.constant 0 : i32
    %c0_i32_0 = arith.constant 0 : i32
    return %arg0, %c0_i32 : i32, i32
  }
  func.func @transform_1(%arg0: i32) -> (i32, i32) {
    %c0_i32 = arith.constant 0 : i32
    %c0_i32_0 = arith.constant 0 : i32
    %c0_i32_1 = arith.constant 0 : i32
    return %c0_i32, %c0_i32_0 : i32, i32
  }
  func.func @transform_2(%arg0: i32) -> (i32, i32) {
    %c0_i32 = arith.constant 0 : i32
    %c0_i32_0 = arith.constant 0 : i32
    %c0_i32_1 = arith.constant 0 : i32
    return %c0_i32, %c0_i32_0 : i32, i32
  }
  func.func @transform_3(%arg0: i32) -> (i32, i32) {
    %c0_i32 = arith.constant 0 : i32
    %c0_i32_0 = arith.constant 0 : i32
    return %arg0, %c0_i32 : i32, i32
  }
}

module attributes {stable_mosaic.version = 11 : i64} {
  func.func @_agg_update_kernel(%arg0: i32, %arg1: i32, %arg2: memref<8x128xf32, #tpu.memory_space<vmem>>, %arg3: memref<8x128xbf16, #tpu.memory_space<vmem>>, %arg4: memref<16x1xi32, #tpu.memory_space<vmem>>, %arg5: memref<1x16xi32, #tpu.memory_space<vmem>>, %arg6: memref<16x1xf32, #tpu.memory_space<vmem>>, %arg7: memref<8x1xf32, #tpu.memory_space<vmem>>, %arg8: memref<128x128xbf16, #tpu.memory_space<vmem>>, %arg9: memref<128x128xbf16, #tpu.memory_space<vmem>>, %arg10: memref<1x128xf32, #tpu.memory_space<vmem>>, %arg11: memref<128x128xbf16, #tpu.memory_space<vmem>>, %arg12: memref<128x128xbf16, #tpu.memory_space<vmem>>, %arg13: memref<128x128xbf16, #tpu.memory_space<vmem>>, %arg14: memref<128x128xbf16, #tpu.memory_space<vmem>>, %arg15: memref<128x128xbf16, #tpu.memory_space<vmem>>, %arg16: memref<128x128xbf16, #tpu.memory_space<vmem>>, %arg17: memref<1x128xf32, #tpu.memory_space<vmem>>, %arg18: memref<1x128xf32, #tpu.memory_space<vmem>>, %arg19: memref<1x128xf32, #tpu.memory_space<vmem>>, %arg20: memref<1x128xf32, #tpu.memory_space<vmem>>, %arg21: memref<8x128xf32, #tpu.memory_space<vmem>>, %arg22: memref<8x128xf32, #tpu.memory_space<vmem>>) attributes {dimension_semantics = [#tpu.dimension_semantics<parallel>, #tpu.dimension_semantics<arbitrary>], iteration_bounds = array<i64: 1, 1>, scalar_prefetch = 0 : i64, scratch_operands = 1 : i64, tpu.core_type = #tpu.core_type<tc>, window_params = [{transform_indices = @transform_0, window_bounds = array<i64: 8, 128>}, {pipeline_mode = #tpu.pipeline_mode<synchronous>, transform_indices = @transform_1, window_bounds = array<i64: 8, 128>}, {transform_indices = @transform_2, window_bounds = array<i64: 16, 1>}, {transform_indices = @transform_3, window_bounds = array<i64: 1, 16>}, {transform_indices = @transform_4, window_bounds = array<i64: 16, 1>}, {transform_indices = @transform_5, window_bounds = array<i64: 8, 1>}, {pipeline_mode = #tpu.pipeline_mode<synchronous>, transform_indices = @transform_6, window_bounds = array<i64: 128, 128>}, {pipeline_mode = #tpu.pipeline_mode<synchronous>, transform_indices = @transform_7, window_bounds = array<i64: 128, 128>}, {pipeline_mode = #tpu.pipeline_mode<synchronous>, transform_indices = @transform_8, window_bounds = array<i64: 1, 128>}, {pipeline_mode = #tpu.pipeline_mode<synchronous>, transform_indices = @transform_9, window_bounds = array<i64: 128, 128>}, {pipeline_mode = #tpu.pipeline_mode<synchronous>, transform_indices = @transform_10, window_bounds = array<i64: 128, 128>}, {pipeline_mode = #tpu.pipeline_mode<synchronous>, transform_indices = @transform_11, window_bounds = array<i64: 128, 128>}, {pipeline_mode = #tpu.pipeline_mode<synchronous>, transform_indices = @transform_12, window_bounds = array<i64: 128, 128>}, {pipeline_mode = #tpu.pipeline_mode<synchronous>, transform_indices = @transform_13, window_bounds = array<i64: 128, 128>}, {pipeline_mode = #tpu.pipeline_mode<synchronous>, transform_indices = @transform_14, window_bounds = array<i64: 128, 128>}, {pipeline_mode = #tpu.pipeline_mode<synchronous>, transform_indices = @transform_15, window_bounds = array<i64: 1, 128>}, {pipeline_mode = #tpu.pipeline_mode<synchronous>, transform_indices = @transform_16, window_bounds = array<i64: 1, 128>}, {pipeline_mode = #tpu.pipeline_mode<synchronous>, transform_indices = @transform_17, window_bounds = array<i64: 1, 128>}, {pipeline_mode = #tpu.pipeline_mode<synchronous>, transform_indices = @transform_18, window_bounds = array<i64: 1, 128>}, {transform_indices = @transform_19, window_bounds = array<i64: 8, 128>}]} {
    %c0_i32 = arith.constant 0 : i32
    %0 = arith.cmpi eq, %arg1, %c0_i32 : i32
    %1 = arith.extui %0 : i1 to i32
    %c0_i32_0 = arith.constant 0 : i32
    %2 = arith.cmpi ne, %1, %c0_i32_0 : i32
    scf.if %2 {
      %cst_15 = arith.constant 0.000000e+00 : f32
      %33 = vector.broadcast %cst_15 : f32 to vector<8x128xf32>
      %c0_16 = arith.constant 0 : index
      %c0_17 = arith.constant 0 : index
      %34 = vector.load %arg22[%c0_16, %c0_17] : memref<8x128xf32, #tpu.memory_space<vmem>>, vector<8x128xf32>
      tpu.vector_store %arg22[%c0_16, %c0_17], %33 {strides = array<i32>} : memref<8x128xf32, #tpu.memory_space<vmem>>, vector<8x128xf32>,
    } else {
    }
    %c0 = arith.constant 0 : index
    %c0_1 = arith.constant 0 : index
    %3 = vector.load %arg4[%c0, %c0_1] : memref<16x1xi32, #tpu.memory_space<vmem>>, vector<16x1xi32>
    %4 = tpu.iota {dimensions = array<i32: 1>} : vector<16x8xi32>
    %5 = vector.broadcast %3 : vector<16x1xi32> to vector<16x8xi32>
    %6 = arith.cmpi eq, %4, %5 : vector<16x8xi32>
    %7 = arith.extui %6 : vector<16x8xi1> to vector<16x8xi32>
    %8 = arith.sitofp %7 : vector<16x8xi32> to vector<16x8xf32>
    %9 = arith.truncf %8 : vector<16x8xf32> to vector<16x8xbf16>
    %c0_2 = arith.constant 0 : index
    %c0_3 = arith.constant 0 : index
    %10 = vector.load %arg3[%c0_2, %c0_3] : memref<8x128xbf16, #tpu.memory_space<vmem>>, vector<8x128xbf16>
    %cst = arith.constant dense<0.000000e+00> : vector<16x128xf32>
    %11 = tpu.matmul %9, %10, %cst {dimension_numbers = #tpu.dot_dimension_numbers<[1], [0], [0], [1], [0, 0, 1, 1], [], []>} : vector<16x8xbf16>, vector<8x128xbf16>, vector<16x128xf32> -> vector<16x128xf32>
    %c0_4 = arith.constant 0 : index
    %c0_5 = arith.constant 0 : index
    %12 = vector.load %arg6[%c0_4, %c0_5] : memref<16x1xf32, #tpu.memory_space<vmem>>, vector<16x1xf32>
    %13 = vector.broadcast %12 : vector<16x1xf32> to vector<16x128xf32>
    %14 = arith.mulf %11, %13 : vector<16x128xf32>
    %c0_6 = arith.constant 0 : index
    %c0_7 = arith.constant 0 : index
    %15 = vector.load %arg5[%c0_6, %c0_7] : memref<1x16xi32, #tpu.memory_space<vmem>>, vector<1x16xi32>
    %c8_i32 = arith.constant 8 : i32
    %16 = arith.muli %arg0, %c8_i32 : i32
    %17 = tpu.iota {dimensions = array<i32: 0>} : vector<8x16xi32>
    %18 = vector.broadcast %16 : i32 to vector<8x16xi32>
    %19 = arith.addi %18, %17 : vector<8x16xi32>
    %20 = vector.broadcast %15 : vector<1x16xi32> to vector<8x16xi32>
    %21 = arith.cmpi eq, %19, %20 : vector<8x16xi32>
    %22 = arith.extui %21 : vector<8x16xi1> to vector<8x16xi32>
    %23 = arith.sitofp %22 : vector<8x16xi32> to vector<8x16xf32>
    %24 = arith.truncf %23 : vector<8x16xf32> to vector<8x16xbf16>
    %c0_8 = arith.constant 0 : index
    %c0_9 = arith.constant 0 : index
    %25 = vector.load %arg22[%c0_8, %c0_9] : memref<8x128xf32, #tpu.memory_space<vmem>>, vector<8x128xf32>
    %26 = arith.truncf %14 : vector<16x128xf32> to vector<16x128xbf16>
    %cst_10 = arith.constant dense<0.000000e+00> : vector<8x128xf32>
    %27 = tpu.matmul %24, %26, %cst_10 {dimension_numbers = #tpu.dot_dimension_numbers<[1], [0], [0], [1], [0, 0, 1, 1], [], []>} : vector<8x16xbf16>, vector<16x128xbf16>, vector<8x128xf32> -> vector<8x128xf32>
    %28 = arith.addf %25, %27 : vector<8x128xf32>
    %c0_11 = arith.constant 0 : index
    %c0_12 = arith.constant 0 : index
    %29 = vector.load %arg22[%c0_11, %c0_12] : memref<8x128xf32, #tpu.memory_space<vmem>>, vector<8x128xf32>
    tpu.vector_store %arg22[%c0_11, %c0_12], %28 {strides = array<i32>} : memref<8x128xf32, #tpu.memory_space<vmem>>, vector<8x128xf32>,
    %c0_i32_13 = arith.constant 0 : i32
    %30 = arith.cmpi eq, %arg1, %c0_i32_13 : i32
    %31 = arith.extui %30 : i1 to i32
    %c0_i32_14 = arith.constant 0 : i32
    %32 = arith.cmpi ne, %31, %c0_i32_14 : i32
    scf.if %32 {
      %c0_15 = arith.constant 0 : index
      %c0_16 = arith.constant 0 : index
      %33 = vector.load %arg2[%c0_15, %c0_16] : memref<8x128xf32, #tpu.memory_space<vmem>>, vector<8x128xf32>
      %c0_17 = arith.constant 0 : index
      %c0_18 = arith.constant 0 : index
      %34 = vector.load %arg22[%c0_17, %c0_18] : memref<8x128xf32, #tpu.memory_space<vmem>>, vector<8x128xf32>
      %c0_19 = arith.constant 0 : index
      %c0_20 = arith.constant 0 : index
      %35 = vector.load %arg7[%c0_19, %c0_20] : memref<8x1xf32, #tpu.memory_space<vmem>>, vector<8x1xf32>
      %36 = vector.broadcast %35 : vector<8x1xf32> to vector<8x128xf32>
      %37 = arith.mulf %34, %36 : vector<8x128xf32>
      %c0_21 = arith.constant 0 : index
      %c0_22 = arith.constant 0 : index
      %38 = vector.load %arg8[%c0_21, %c0_22] : memref<128x128xbf16, #tpu.memory_space<vmem>>, vector<128x128xbf16>
      %39 = arith.truncf %37 : vector<8x128xf32> to vector<8x128xbf16>
      %cst_23 = arith.constant dense<0.000000e+00> : vector<8x128xf32>
      %40 = tpu.matmul %39, %38, %cst_23 {dimension_numbers = #tpu.dot_dimension_numbers<[1], [0], [0], [1], [0, 0, 1, 1], [], []>} : vector<8x128xbf16>, vector<128x128xbf16>, vector<8x128xf32> -> vector<8x128xf32>
      %c0_24 = arith.constant 0 : index
      %c0_25 = arith.constant 0 : index
      %41 = vector.load %arg9[%c0_24, %c0_25] : memref<128x128xbf16, #tpu.memory_space<vmem>>, vector<128x128xbf16>
      %42 = arith.truncf %33 : vector<8x128xf32> to vector<8x128xbf16>
      %cst_26 = arith.constant dense<0.000000e+00> : vector<8x128xf32>
      %43 = tpu.matmul %42, %41, %cst_26 {dimension_numbers = #tpu.dot_dimension_numbers<[1], [0], [0], [1], [0, 0, 1, 1], [], []>} : vector<8x128xbf16>, vector<128x128xbf16>, vector<8x128xf32> -> vector<8x128xf32>
      %44 = arith.addf %40, %43 : vector<8x128xf32>
      %c0_27 = arith.constant 0 : index
      %c0_28 = arith.constant 0 : index
      %45 = vector.load %arg10[%c0_27, %c0_28] : memref<1x128xf32, #tpu.memory_space<vmem>>, vector<1x128xf32>
      %46 = vector.broadcast %45 : vector<1x128xf32> to vector<8x128xf32>
      %47 = arith.addf %44, %46 : vector<8x128xf32>
      %cst_29 = arith.constant 0.000000e+00 : f32
      %48 = vector.broadcast %cst_29 : f32 to vector<8x128xf32>
      %49 = arith.cmpf ogt, %47, %48 : vector<8x128xf32>
      %cst_30 = arith.constant 0.00999999977 : f32
      %50 = vector.broadcast %cst_30 : f32 to vector<8x128xf32>
      %51 = arith.mulf %50, %47 : vector<8x128xf32>
      %52 = arith.select %49, %47, %51 : vector<8x128xi1>, vector<8x128xf32>
      %c0_31 = arith.constant 0 : index
      %c0_32 = arith.constant 0 : index
      %53 = vector.load %arg11[%c0_31, %c0_32] : memref<128x128xbf16, #tpu.memory_space<vmem>>, vector<128x128xbf16>
      %54 = arith.truncf %52 : vector<8x128xf32> to vector<8x128xbf16>
      %cst_33 = arith.constant dense<0.000000e+00> : vector<8x128xf32>
      %55 = tpu.matmul %54, %53, %cst_33 {dimension_numbers = #tpu.dot_dimension_numbers<[1], [0], [0], [1], [0, 0, 1, 1], [], []>} : vector<8x128xbf16>, vector<128x128xbf16>, vector<8x128xf32> -> vector<8x128xf32>
      %c0_34 = arith.constant 0 : index
      %c0_35 = arith.constant 0 : index
      %56 = vector.load %arg14[%c0_34, %c0_35] : memref<128x128xbf16, #tpu.memory_space<vmem>>, vector<128x128xbf16>
      %57 = arith.truncf %33 : vector<8x128xf32> to vector<8x128xbf16>
      %cst_36 = arith.constant dense<0.000000e+00> : vector<8x128xf32>
      %58 = tpu.matmul %57, %56, %cst_36 {dimension_numbers = #tpu.dot_dimension_numbers<[1], [0], [0], [1], [0, 0, 1, 1], [], []>} : vector<8x128xbf16>, vector<128x128xbf16>, vector<8x128xf32> -> vector<8x128xf32>
      %59 = arith.addf %55, %58 : vector<8x128xf32>
      %c0_37 = arith.constant 0 : index
      %c0_38 = arith.constant 0 : index
      %60 = vector.load %arg17[%c0_37, %c0_38] : memref<1x128xf32, #tpu.memory_space<vmem>>, vector<1x128xf32>
      %61 = vector.broadcast %60 : vector<1x128xf32> to vector<8x128xf32>
      %62 = arith.addf %59, %61 : vector<8x128xf32>
      %63 = arith.negf %62 : vector<8x128xf32>
      %64 = math.exp %63 : vector<8x128xf32>
      %cst_39 = arith.constant 1.000000e+00 : f32
      %65 = vector.broadcast %cst_39 : f32 to vector<8x128xf32>
      %66 = arith.addf %65, %64 : vector<8x128xf32>
      %67 = arith.divf %65, %66 : vector<8x128xf32>
      %c0_40 = arith.constant 0 : index
      %c0_41 = arith.constant 0 : index
      %68 = vector.load %arg12[%c0_40, %c0_41] : memref<128x128xbf16, #tpu.memory_space<vmem>>, vector<128x128xbf16>
      %69 = arith.truncf %52 : vector<8x128xf32> to vector<8x128xbf16>
      %cst_42 = arith.constant dense<0.000000e+00> : vector<8x128xf32>
      %70 = tpu.matmul %69, %68, %cst_42 {dimension_numbers = #tpu.dot_dimension_numbers<[1], [0], [0], [1], [0, 0, 1, 1], [], []>} : vector<8x128xbf16>, vector<128x128xbf16>, vector<8x128xf32> -> vector<8x128xf32>
      %c0_43 = arith.constant 0 : index
      %c0_44 = arith.constant 0 : index
      %71 = vector.load %arg15[%c0_43, %c0_44] : memref<128x128xbf16, #tpu.memory_space<vmem>>, vector<128x128xbf16>
      %72 = arith.truncf %33 : vector<8x128xf32> to vector<8x128xbf16>
      %cst_45 = arith.constant dense<0.000000e+00> : vector<8x128xf32>
      %73 = tpu.matmul %72, %71, %cst_45 {dimension_numbers = #tpu.dot_dimension_numbers<[1], [0], [0], [1], [0, 0, 1, 1], [], []>} : vector<8x128xbf16>, vector<128x128xbf16>, vector<8x128xf32> -> vector<8x128xf32>
      %74 = arith.addf %70, %73 : vector<8x128xf32>
      %c0_46 = arith.constant 0 : index
      %c0_47 = arith.constant 0 : index
      %75 = vector.load %arg18[%c0_46, %c0_47] : memref<1x128xf32, #tpu.memory_space<vmem>>, vector<1x128xf32>
      %76 = vector.broadcast %75 : vector<1x128xf32> to vector<8x128xf32>
      %77 = arith.addf %74, %76 : vector<8x128xf32>
      %78 = arith.negf %77 : vector<8x128xf32>
      %79 = math.exp %78 : vector<8x128xf32>
      %cst_48 = arith.constant 1.000000e+00 : f32
      %80 = vector.broadcast %cst_48 : f32 to vector<8x128xf32>
      %81 = arith.addf %80, %79 : vector<8x128xf32>
      %82 = arith.divf %80, %81 : vector<8x128xf32>
      %c0_49 = arith.constant 0 : index
      %c0_50 = arith.constant 0 : index
      %83 = vector.load %arg13[%c0_49, %c0_50] : memref<128x128xbf16, #tpu.memory_space<vmem>>, vector<128x128xbf16>
      %84 = arith.truncf %52 : vector<8x128xf32> to vector<8x128xbf16>
      %cst_51 = arith.constant dense<0.000000e+00> : vector<8x128xf32>
      %85 = tpu.matmul %84, %83, %cst_51 {dimension_numbers = #tpu.dot_dimension_numbers<[1], [0], [0], [1], [0, 0, 1, 1], [], []>} : vector<8x128xbf16>, vector<128x128xbf16>, vector<8x128xf32> -> vector<8x128xf32>
      %c0_52 = arith.constant 0 : index
      %c0_53 = arith.constant 0 : index
      %86 = vector.load %arg19[%c0_52, %c0_53] : memref<1x128xf32, #tpu.memory_space<vmem>>, vector<1x128xf32>
      %87 = vector.broadcast %86 : vector<1x128xf32> to vector<8x128xf32>
      %88 = arith.addf %85, %87 : vector<8x128xf32>
      %c0_54 = arith.constant 0 : index
      %c0_55 = arith.constant 0 : index
      %89 = vector.load %arg16[%c0_54, %c0_55] : memref<128x128xbf16, #tpu.memory_space<vmem>>, vector<128x128xbf16>
      %90 = arith.truncf %33 : vector<8x128xf32> to vector<8x128xbf16>
      %cst_56 = arith.constant dense<0.000000e+00> : vector<8x128xf32>
      %91 = tpu.matmul %90, %89, %cst_56 {dimension_numbers = #tpu.dot_dimension_numbers<[1], [0], [0], [1], [0, 0, 1, 1], [], []>} : vector<8x128xbf16>, vector<128x128xbf16>, vector<8x128xf32> -> vector<8x128xf32>
      %c0_57 = arith.constant 0 : index
      %c0_58 = arith.constant 0 : index
      %92 = vector.load %arg20[%c0_57, %c0_58] : memref<1x128xf32, #tpu.memory_space<vmem>>, vector<1x128xf32>
      %93 = vector.broadcast %92 : vector<1x128xf32> to vector<8x128xf32>
      %94 = arith.addf %91, %93 : vector<8x128xf32>
      %95 = arith.mulf %67, %94 : vector<8x128xf32>
      %96 = arith.addf %88, %95 : vector<8x128xf32>
      %97 = math.tanh %96 : vector<8x128xf32>
      %cst_59 = arith.constant 1.000000e+00 : f32
      %98 = vector.broadcast %cst_59 : f32 to vector<8x128xf32>
      %99 = arith.subf %98, %82 : vector<8x128xf32>
      %100 = arith.mulf %99, %97 : vector<8x128xf32>
      %101 = arith.mulf %82, %33 : vector<8x128xf32>
      %102 = arith.addf %100, %101 : vector<8x128xf32>
      %c0_60 = arith.constant 0 : index
      %c0_61 = arith.constant 0 : index
      %103 = vector.load %arg21[%c0_60, %c0_61] : memref<8x128xf32, #tpu.memory_space<vmem>>, vector<8x128xf32>
      tpu.vector_store %arg21[%c0_60, %c0_61], %102 {strides = array<i32>} : memref<8x128xf32, #tpu.memory_space<vmem>>, vector<8x128xf32>,
    } else {
    }
    return
  }
  func.func @transform_0(%arg0: i32, %arg1: i32) -> (i32, i32) {
    %c0_i32 = arith.constant 0 : i32
    %c0_i32_0 = arith.constant 0 : i32
    return %arg0, %c0_i32 : i32, i32
  }
  func.func @transform_1(%arg0: i32, %arg1: i32) -> (i32, i32) {
    %c0_i32 = arith.constant 0 : i32
    %c0_i32_0 = arith.constant 0 : i32
    %c0_i32_1 = arith.constant 0 : i32
    return %c0_i32, %c0_i32_0 : i32, i32
  }
  func.func @transform_2(%arg0: i32, %arg1: i32) -> (i32, i32) {
    %c0_i32 = arith.constant 0 : i32
    %c0_i32_0 = arith.constant 0 : i32
    return %arg1, %c0_i32 : i32, i32
  }
  func.func @transform_3(%arg0: i32, %arg1: i32) -> (i32, i32) {
    %c0_i32 = arith.constant 0 : i32
    %c0_i32_0 = arith.constant 0 : i32
    return %c0_i32, %arg1 : i32, i32
  }
  func.func @transform_4(%arg0: i32, %arg1: i32) -> (i32, i32) {
    %c0_i32 = arith.constant 0 : i32
    %c0_i32_0 = arith.constant 0 : i32
    return %arg1, %c0_i32 : i32, i32
  }
  func.func @transform_5(%arg0: i32, %arg1: i32) -> (i32, i32) {
    %c0_i32 = arith.constant 0 : i32
    %c0_i32_0 = arith.constant 0 : i32
    return %arg0, %c0_i32 : i32, i32
  }
  func.func @transform_6(%arg0: i32, %arg1: i32) -> (i32, i32) {
    %c0_i32 = arith.constant 0 : i32
    %c0_i32_0 = arith.constant 0 : i32
    %c0_i32_1 = arith.constant 0 : i32
    return %c0_i32, %c0_i32_0 : i32, i32
  }
  func.func @transform_7(%arg0: i32, %arg1: i32) -> (i32, i32) {
    %c0_i32 = arith.constant 0 : i32
    %c0_i32_0 = arith.constant 0 : i32
    %c0_i32_1 = arith.constant 0 : i32
    return %c0_i32, %c0_i32_0 : i32, i32
  }
  func.func @transform_8(%arg0: i32, %arg1: i32) -> (i32, i32) {
    %c0_i32 = arith.constant 0 : i32
    %c0_i32_0 = arith.constant 0 : i32
    %c0_i32_1 = arith.constant 0 : i32
    return %c0_i32, %c0_i32_0 : i32, i32
  }
  func.func @transform_9(%arg0: i32, %arg1: i32) -> (i32, i32) {
    %c0_i32 = arith.constant 0 : i32
    %c0_i32_0 = arith.constant 0 : i32
    %c0_i32_1 = arith.constant 0 : i32
    return %c0_i32, %c0_i32_0 : i32, i32
  }
  func.func @transform_10(%arg0: i32, %arg1: i32) -> (i32, i32) {
    %c0_i32 = arith.constant 0 : i32
    %c0_i32_0 = arith.constant 0 : i32
    %c0_i32_1 = arith.constant 0 : i32
    return %c0_i32, %c0_i32_0 : i32, i32
  }
  func.func @transform_11(%arg0: i32, %arg1: i32) -> (i32, i32) {
    %c0_i32 = arith.constant 0 : i32
    %c0_i32_0 = arith.constant 0 : i32
    %c0_i32_1 = arith.constant 0 : i32
    return %c0_i32, %c0_i32_0 : i32, i32
  }
  func.func @transform_12(%arg0: i32, %arg1: i32) -> (i32, i32) {
    %c0_i32 = arith.constant 0 : i32
    %c0_i32_0 = arith.constant 0 : i32
    %c0_i32_1 = arith.constant 0 : i32
    return %c0_i32, %c0_i32_0 : i32, i32
  }
  func.func @transform_13(%arg0: i32, %arg1: i32) -> (i32, i32) {
    %c0_i32 = arith.constant 0 : i32
    %c0_i32_0 = arith.constant 0 : i32
    %c0_i32_1 = arith.constant 0 : i32
    return %c0_i32, %c0_i32_0 : i32, i32
  }
  func.func @transform_14(%arg0: i32, %arg1: i32) -> (i32, i32) {
    %c0_i32 = arith.constant 0 : i32
    %c0_i32_0 = arith.constant 0 : i32
    %c0_i32_1 = arith.constant 0 : i32
    return %c0_i32, %c0_i32_0 : i32, i32
  }
  func.func @transform_15(%arg0: i32, %arg1: i32) -> (i32, i32) {
    %c0_i32 = arith.constant 0 : i32
    %c0_i32_0 = arith.constant 0 : i32
    %c0_i32_1 = arith.constant 0 : i32
    return %c0_i32, %c0_i32_0 : i32, i32
  }
  func.func @transform_16(%arg0: i32, %arg1: i32) -> (i32, i32) {
    %c0_i32 = arith.constant 0 : i32
    %c0_i32_0 = arith.constant 0 : i32
    %c0_i32_1 = arith.constant 0 : i32
    return %c0_i32, %c0_i32_0 : i32, i32
  }
  func.func @transform_17(%arg0: i32, %arg1: i32) -> (i32, i32) {
    %c0_i32 = arith.constant 0 : i32
    %c0_i32_0 = arith.constant 0 : i32
    %c0_i32_1 = arith.constant 0 : i32
    return %c0_i32, %c0_i32_0 : i32, i32
  }
  func.func @transform_18(%arg0: i32, %arg1: i32) -> (i32, i32) {
    %c0_i32 = arith.constant 0 : i32
    %c0_i32_0 = arith.constant 0 : i32
    %c0_i32_1 = arith.constant 0 : i32
    return %c0_i32, %c0_i32_0 : i32, i32
  }
  func.func @transform_19(%arg0: i32, %arg1: i32) -> (i32, i32) {
    %c0_i32 = arith.constant 0 : i32
    %c0_i32_0 = arith.constant 0 : i32
    return %arg0, %c0_i32 : i32, i32
  }
}

</mosaic_0001>

<bundles_post_ra>
// kernel: node_model_forward.2
= control target key start
LH: loop header
LB: loop body
LE: loop exit
PB: predicated region body
PF: predicated region fallthrough
CT: control target
= control target key end

     0   :  { %s200_s1 = inlined_call_operand.vmem [shape: bf16[128,128], index: 1, kind: input, shape index: {}]   ;;  %s201_s2 = inlined_call_operand.vmem [shape: f32[1,128], index: 2, kind: input, shape index: {}]   ;;  %s202_s0 = inlined_call_operand.vmem [shape: f32[8,128], index: 0, kind: input, shape index: {}]   ;;  %s203_s3 = inlined_call_operand.vmem [shape: bf16[8,128], index: 3, kind: output, shape index: {}]  }
   0x1   :  { %v145_v0 = vld [vmem:[%s200_s1 + $0x38] sm:$0xff]  ;;  %v144_v1 = vld [vmem:[%s200_s1 + $0x30] sm:$0xff]  ;;  %v143_v2 = vld [vmem:[%s200_s1 + $0x28] sm:$0xff] }
   0x2   :  { %84 = vmatpush.bf16.msra.mxu0 %v145_v0  ;;  %v142_v3 = vld [vmem:[%s200_s1 + $0x20] sm:$0xff]  ;;  %v141_v4 = vld [vmem:[%s200_s1 + $0x18] sm:$0xff]  ;;  %v140_v5 = vld [vmem:[%s200_s1 + $0x10] sm:$0xff] }
   0x3   :  { %v139_v6 = vld [vmem:[%s200_s1 + $0x8] sm:$0xff]  ;;  %v138_v7 = vld [vmem:[%s200_s1] sm:$0xff] }
   0x4   :  { %v14_v8 = vld [vmem:[%s202_s0] sm:$0xff] }
   0x5   :  { %v31_v9 = vpack.c.bf16 %v14_v8, %v14_v8  ;;  %v146_v10 = vld [vmem:[%s201_s2] ss:$0 sm:$0xff] }
   0x6   :  { %85 = vmatpush.bf16.msra.mxu0 %v144_v1 }
   0xa   :  { %86 = vmatpush.bf16.msra.mxu0 %v143_v2 }
   0xe   :  { %87 = vmatpush.bf16.msra.mxu0 %v142_v3 }
  0x12   :  { %88 = vmatpush.bf16.msra.mxu0 %v141_v4 }
  0x16   :  { %89 = vmatpush.bf16.msra.mxu0 %v140_v5 }
  0x1a   :  { %90 = vmatpush.bf16.msra.mxu0 %v139_v6 }
  0x1e   :  { %91 = vmatpush.bf16.msra.mxu0 %v138_v7 }
  0x21   :  { %92 = vmatmul.bf16.vlgmr.msra.gmra.mxu0 %v31_v9 }
  0x9e   :  { %v93_v11 = vpop.f32.mrf.mxu0 }
  0x9f   :  { %v94_v12 = vadd.f32 %v146_v10, %v93_v11 }
  0xa1   :  { %vm97_vm0 = vcmp.gt.f32.partialorder %v94_v12, 0.0  ;;  %v98_v13 = vmul.f32 0.01, %v94_v12 }
  0xa3   :  { %v99_v14 = vsel %vm97_vm0, %v94_v12, %v98_v13 }
  0xa4   :  { %v100_v15 = vpack.c.bf16 %v99_v14, %v99_v14 }
  0xa6   :  { %101 = vst [vmem:[%s203_s3] sm:$0xf] %v100_v15  ;;  %v95_v16 = vpop.f32.mrf.mxu0 }

// kernel: node_model_forward.3
= control target key start
LH: loop header
LB: loop body
LE: loop exit
PB: predicated region body
PF: predicated region fallthrough
CT: control target
= control target key end

     0   :  { %v1209_v0 = vmov 0   ;;  %vm90_vm0 = vcmask 1043456   ;;  %v70_v7 = vlaneseq  ;;  %v1210_v11 = vmov 0.0   ;;  %s1556_s2 = inlined_call_operand.vmem [shape: s32[16,1], index: 2, kind: input, shape index: {}]   ;;  %s1557_s1 = inlined_call_operand.vmem [shape: bf16[8,128], index: 1, kind: input, shape index: {}]   ;;  %s1558_s4 = inlined_call_operand.vmem [shape: f32[16,1], index: 4, kind: input, shape index: {}]   ;;  %s1559_s3 = inlined_call_operand.vmem [shape: s32[1,16], index: 3, kind: input, shape index: {}]   ;;  %s1560_s5 = inlined_call_operand.vmem [shape: f32[8,1], index: 5, kind: input, shape index: {}]   ;;  %s1561_s7 = inlined_call_operand.vmem [shape: bf16[128,128], index: 7, kind: input, shape index: {}]   ;;  %s1562_s6 = inlined_call_operand.vmem [shape: bf16[128,128], index: 6, kind: input, shape index: {}]   ;;  %s1563_s0 = inlined_call_operand.vmem [shape: f32[8,128], index: 0, kind: input, shape index: {}, may-alias: {0,19}]   ;;  %s1564_s8 = inlined_call_operand.vmem [shape: f32[1,128], index: 8, kind: input, shape index: {}]   ;;  %s1565_s12 = inlined_call_operand.vmem [shape: bf16[128,128], index: 12, kind: input, shape index: {}]   ;;  %s1566_s9 = inlined_call_operand.vmem [shape: bf16[128,128], index: 9, kind: input, shape index: {}]   ;;  %s1567_s13 = inlined_call_operand.vmem [shape: bf16[128,128], index: 13, kind: input, shape index: {}]   ;;  %s1568_s10 = inlined_call_operand.vmem [shape: bf16[128,128], index: 10, kind: input, shape index: {}]   ;;  %s1569_s11 = inlined_call_operand.vmem [shape: bf16[128,128], index: 11, kind: input, shape index: {}]   ;;  %s1570_s15 = inlined_call_operand.vmem [shape: f32[1,128], index: 15, kind: input, shape index: {}]   ;;  %s1571_s14 = inlined_call_operand.vmem [shape: bf16[128,128], index: 14, kind: input, shape index: {}]   ;;  %s1572_s17 = inlined_call_operand.vmem [shape: f32[1,128], index: 17, kind: input, shape index: {}]   ;;  %s1573_s16 = inlined_call_operand.vmem [shape: f32[1,128], index: 16, kind: input, shape index: {}]   ;;  %s1574_s18 = inlined_call_operand.vmem [shape: f32[1,128], index: 18, kind: input, shape index: {}]   ;;  %s1575_s19 = inlined_call_operand.vmem [shape: f32[8,128], index: 19, kind: output, shape index: {}, may-alias: {0,19}]  }
   0x1   :  { %1578 = sst [smem:[#allocation3_spill]] %s1556_s2  ;;  %1190 = vset.pattern.permute.xlu0 %v1209_v0  ;;  %1191 = vset.pattern.permute.xlu1 %v1209_v0  ;;  %vm86_vm3 = vcmask 64512   ;;  %v159_v15 = vld [vmem:[%s1560_s5] sm:$0xff]  ;;  %v1139_v16 = vld [vmem:[%s1561_s7 + $0x38] sm:$0xff]  ;;  %v1138_v18 = vld [vmem:[%s1561_s7 + $0x30] sm:$0xff]  ;;  %vm135_vm5 = vcmask 130048  }
   0x2   :  { %1579 = sst [smem:[#allocation4_spill]] %s1557_s1  ;;  %1192 = vset.pattern.permute.xlu2 %v1209_v0  ;;  %v71_v9 = vand.u32 127, %v70_v7  ;;  %v1131_v17 = vld [vmem:[%s1562_s6 + $0x38] sm:$0xff]  ;;  %248 = vmatpush.bf16.msra.mxu2 %v1139_v16  ;;  %v1130_v19 = vld [vmem:[%s1562_s6 + $0x30] sm:$0xff]  ;;  %v1137_v20 = vld [vmem:[%s1561_s7 + $0x28] sm:$0xff]  ;;  %v125_v28 = vshrl.u32 %v70_v7, 7 }
   0x3   :  { %1580 = sst [smem:[#allocation5_spill]] %s1558_s4  ;;  %162 = vperm.xlu2 %1192, %v159_v15   ;;  %309 = vmatpush.bf16.msra.mxu3 %v1131_v17  ;;  %v1129_v21 = vld [vmem:[%s1562_s6 + $0x28] sm:$0xff]  ;;  %v1136_v22 = vld [vmem:[%s1561_s7 + $0x20] sm:$0xff]  ;;  %v1135_v25 = vld [vmem:[%s1561_s7 + $0x18] sm:$0xff] }
   0x4   :  { %1581 = sst [smem:[#allocation6_spill]] %s1559_s3  ;;  %v1128_v23 = vld [vmem:[%s1562_s6 + $0x20] sm:$0xff]  ;;  %v1127_v26 = vld [vmem:[%s1562_s6 + $0x18] sm:$0xff]  ;;  %v1134_v30 = vld [vmem:[%s1561_s7 + $0x10] sm:$0xff] }
   0x5   :  { %s1582_s20 = sld [smem:[#allocation3_spill]]  ;;  %v1126_v31 = vld [vmem:[%s1562_s6 + $0x10] sm:$0xff]  ;;  %v1133_v32 = vld [vmem:[%s1561_s7 + $0x8] sm:$0xff]  ;;  %v1132_v39 = vld [vmem:[%s1561_s7] sm:$0xff] }
   0x6   :  { %s1583_s23 = sld [smem:[#allocation4_spill]]  ;;  %249 = vmatpush.bf16.msra.mxu2 %v1138_v18  ;;  %v1125_v33 = vld [vmem:[%s1562_s6 + $0x8] sm:$0xff]  ;;  %v1380_v40 = vld [vmem:[%s1563_s0] sm:$0xff]  ;;  %v1155_v45 = vld [vmem:[%s1565_s12 + $0x38] sm:$0xff] }
   0x7   :  { %s1584_s3 = sld [smem:[#allocation5_spill]]  ;;  %310 = vmatpush.bf16.msra.mxu3 %v1130_v19  ;;  %v1384_v43 = vpack.c.bf16 %v1380_v40, %v1380_v40  ;;  %v1124_v44 = vld [vmem:[%s1562_s6] sm:$0xff]  ;;  %v1154_v46 = vld [vmem:[%s1565_s12 + $0x30] sm:$0xff]  ;;  %v1147_v47 = vld [vmem:[%s1566_s9 + $0x38] sm:$0xff] }
   0x8   :  { %s1585_s4 = sld [smem:[#allocation6_spill]]  ;;  %v1171_v48 = vld [vmem:[%s1567_s13 + $0x38] sm:$0xff]  ;;  %v1146_v49 = vld [vmem:[%s1566_s9 + $0x30] sm:$0xff]  ;;  %v1153_v52 = vld [vmem:[%s1565_s12 + $0x28] sm:$0xff] }
   0x9   :  { %v1170_v50 = vld [vmem:[%s1567_s13 + $0x30] sm:$0xff]  ;;  %v1163_v51 = vld [vmem:[%s1568_s10 + $0x38] sm:$0xff]  ;;  %v1145_v54 = vld [vmem:[%s1566_s9 + $0x28] sm:$0xff] }
   0xa   :  { %250 = vmatpush.bf16.msra.mxu2 %v1137_v20  ;;  %v1162_v53 = vld [vmem:[%s1568_s10 + $0x30] sm:$0xff]  ;;  %v1169_v55 = vld [vmem:[%s1567_s13 + $0x28] sm:$0xff]  ;;  %v1152_v56 = vld [vmem:[%s1565_s12 + $0x20] sm:$0xff] }
   0xb   :  { %v68_v1 = vld [vmem:[%s1582_s20] sm:$0xff]  ;;  %v69_v2 = vld [vmem:[%s1582_s20 + $0x8] sm:$0xff]  ;;  %311 = vmatpush.bf16.msra.mxu3 %v1129_v21  ;;  %v1151_v60 = vld [vmem:[%s1565_s12 + $0x18] sm:$0xff] }
   0xc   :  { %73 = vperm.xlu0 %1190, %v68_v1   ;;  %v85_v3 = vld [vmem:[%s1583_s23] sm:$0xf]  ;;  %v1161_v57 = vld [vmem:[%s1568_s10 + $0x28] sm:$0xff]  ;;  %v1143_v62 = vld [vmem:[%s1566_s9 + $0x18] sm:$0xff] }
   0xd   :  { %v92_v4 = vsel %vm90_vm0, %v85_v3, 0  ;;  %v108_v5 = vld [vmem:[%s1584_s3] sm:$0xff]  ;;  %v109_v6 = vld [vmem:[%s1584_s3 + $0x8] sm:$0xff]  ;;  %v1167_v63 = vld [vmem:[%s1567_s13 + $0x18] sm:$0xff] }
   0xe   :  { %101 = vmatpush.bf16.msra.mxu0 %v92_v4  ;;  %112 = vperm.xlu1 %1191, %v108_v5   ;;  %v1193_v29 = vld [vmem:[%s1585_s4] ss:$0 sm:$0xff]  ;;  %v1150_v0 = vld [vmem:[%s1565_s12 + $0x10] sm:$0xff]  ;;  %v1159_v1 = vld [vmem:[%s1568_s10 + $0x18] sm:$0xff] }
   0xf   :  { %251 = vmatpush.bf16.msra.mxu2 %v1136_v22  ;;  %312 = vmatpush.bf16.msra.mxu3 %v1128_v23  ;;  %vm129_vm4 = vcmp.eq.s32.totalorder %v125_v28, %v1193_v29  ;;  %v1144_v58 = vld [vmem:[%s1566_s9 + $0x20] sm:$0xff]  ;;  %v1166_v3 = vld [vmem:[%s1567_s13 + $0x10] sm:$0xff]  ;;  %v1149_v5 = vld [vmem:[%s1565_s12 + $0x8] sm:$0xff] }
  0x10   :  { %v864_v38 = vsel %vm129_vm4, 1.0, %v1210_v11  ;;  %v1168_v59 = vld [vmem:[%s1567_s13 + $0x20] sm:$0xff]  ;;  %v1177_v17 = vld [vmem:[%s1569_s11 + $0x28] sm:$0xff]  ;;  %v1175_v20 = vld [vmem:[%s1569_s11 + $0x18] sm:$0xff] }
  0x11   :  { %v132_v42 = vpack.c.bf16 %v864_v38, %v864_v38  ;;  %v1160_v61 = vld [vmem:[%s1568_s10 + $0x20] sm:$0xff]  ;;  %v1174_v21 = vld [vmem:[%s1569_s11 + $0x10] sm:$0xff]  ;;  %v1187_v23 = vld [vmem:[%s1571_s14 + $0x38] sm:$0xff] }
  0x12   :  { %411 = vmatpush.bf16.msrb.mxu0 %v1155_v45  ;;  %v1176_v18 = vld [vmem:[%s1569_s11 + $0x20] sm:$0xff] }
  0x13   :  { %252 = vmatpush.bf16.msra.mxu2 %v1135_v25  ;;  %313 = vmatpush.bf16.msra.mxu3 %v1127_v26  ;;  %v1140_v22 = vld [vmem:[%s1566_s9] sm:$0xff]  ;;  %v1157_v25 = vld [vmem:[%s1568_s10 + $0x8] sm:$0xff] }
  0x14   :  { %76 = vperm.xlu0 %1190, %v69_v2   ;;  %v1142_v2 = vld [vmem:[%s1566_s9 + $0x10] sm:$0xff]  ;;  %v1173_v26 = vld [vmem:[%s1569_s11 + $0x8] sm:$0xff]  ;;  %v1156_v28 = vld [vmem:[%s1568_s10] sm:$0xff] }
  0x15   :  { %v1172_v29 = vld [vmem:[%s1569_s11] sm:$0xff] }
  0x16   :  { %117 = vperm.xlu1 %1191, %v109_v6   ;;  %412 = vmatpush.bf16.msrb.mxu0 %v1154_v46  ;;  %v1158_v6 = vld [vmem:[%s1568_s10 + $0x10] sm:$0xff] }
  0x17   :  { %253 = vmatpush.bf16.msra.mxu2 %v1134_v30  ;;  %314 = vmatpush.bf16.msra.mxu3 %v1126_v31  ;;  %v1185_v30 = vld [vmem:[%s1571_s14 + $0x28] sm:$0xff]  ;;  %v1184_v31 = vld [vmem:[%s1571_s14 + $0x20] sm:$0xff] }
  0x1a   :  { %413 = vmatpush.bf16.msrb.mxu0 %v1153_v52 }
  0x1b   :  { %254 = vmatpush.bf16.msra.mxu2 %v1133_v32  ;;  %315 = vmatpush.bf16.msra.mxu3 %v1125_v33  ;;  %v1183_v32 = vld [vmem:[%s1571_s14 + $0x18] sm:$0xff]  ;;  %v1182_v33 = vld [vmem:[%s1571_s14 + $0x10] sm:$0xff] }
  0x1e   :  { %414 = vmatpush.bf16.msrb.mxu0 %v1152_v56  ;;  %v1197_v56 = vld [vmem:[%s1573_s16] ss:$0 sm:$0xff] }
  0x1f   :  { %255 = vmatpush.bf16.msra.mxu2 %v1132_v39  ;;  %316 = vmatpush.bf16.msra.mxu3 %v1124_v44 }
  0x22   :  { %256 = vmatmul.bf16.vlgmr.msra.gmra.mxu2 %v1384_v43  ;;  %415 = vmatpush.bf16.msrb.mxu0 %v1151_v60 }
  0x23   :  { %589 = vmatpush.bf16.msrb.mxu2 %v1171_v48  ;;  %650 = vmatpush.bf16.msrb.mxu3 %v1163_v51 }
  0x26   :  { %416 = vmatpush.bf16.msrb.mxu0 %v1150_v0 }
  0x27   :  { %590 = vmatpush.bf16.msrb.mxu2 %v1170_v50  ;;  %651 = vmatpush.bf16.msrb.mxu3 %v1162_v53  ;;  %v1195_v50 = vld [vmem:[%s1570_s15] ss:$0 sm:$0xff] }
  0x2a   :  { %417 = vmatpush.bf16.msrb.mxu0 %v1149_v5 }
  0x2b   :  { %591 = vmatpush.bf16.msrb.mxu2 %v1169_v55  ;;  %652 = vmatpush.bf16.msrb.mxu3 %v1161_v57 }
  0x2f   :  { %592 = vmatpush.bf16.msrb.mxu2 %v1168_v59  ;;  %653 = vmatpush.bf16.msrb.mxu3 %v1160_v61 }
  0x33   :  { %593 = vmatpush.bf16.msrb.mxu2 %v1167_v63  ;;  %654 = vmatpush.bf16.msrb.mxu3 %v1159_v1 }
  0x37   :  { %594 = vmatpush.bf16.msrb.mxu2 %v1166_v3  ;;  %655 = vmatpush.bf16.msrb.mxu3 %v1158_v6 }
  0x3b   :  { %656 = vmatpush.bf16.msrb.mxu3 %v1157_v25 }
  0x3f   :  { %657 = vmatpush.bf16.msrb.mxu3 %v1156_v28 }
  0x5d   :  { %v163_v4 = vpop.permute.xlu2 %162 }
  0x7e   :  { %v74_v8 = vpop.permute.xlu0 %73 }
  0x7f   :  { %vm78_vm1 = vcmp.eq.s32.totalorder %v71_v9, %v74_v8  ;;  %v1141_v8 = vld [vmem:[%s1566_s9 + $0x8] sm:$0xff] }
  0x80   :  { %v861_v12 = vsel %vm78_vm1, 1.0, %v1210_v11  ;;  %v113_v24 = vpop.permute.xlu1 %112 }
  0x86   :  { %v77_v10 = vpop.permute.xlu0 %76 }
  0x87   :  { %vm79_vm2 = vcmp.eq.s32.totalorder %v71_v9, %v77_v10  ;;  %v1165_v9 = vld [vmem:[%s1567_s13 + $0x8] sm:$0xff] }
  0x88   :  { %v862_v13 = vsel %vm79_vm2, 1.0, %v1210_v11  ;;  %v118_v34 = vpop.permute.xlu1 %117  ;;  %v1148_v11 = vld [vmem:[%s1565_s12] sm:$0xff]  ;;  %595 = vmatpush.bf16.msrb.mxu2 %v1165_v9 }
  0x89   :  { %v84_v14 = vpack.c.bf16 %v862_v13, %v861_v12  ;;  %v1179_v13 = vld [vmem:[%s1569_s11 + $0x38] sm:$0xff]  ;;  %418 = vmatpush.bf16.msrb.mxu0 %v1148_v11 }
  0x8b   :  { %863 = vmatmul.msk.bf16.vlgmr.msra.gmra.mxu0 %vm86_vm3, %v84_v14  ;;  %v1178_v14 = vld [vmem:[%s1569_s11 + $0x30] sm:$0xff] }
  0x8d   :  { %755 = vmatpush.bf16.msra.mxu0 %v1179_v13  ;;  %v1196_v13 = vld [vmem:[%s1572_s17] ss:$0 sm:$0xff] }
  0x91   :  { %756 = vmatpush.bf16.msra.mxu0 %v1178_v14 }
  0x95   :  { %757 = vmatpush.bf16.msra.mxu0 %v1177_v17 }
  0x99   :  { %758 = vmatpush.bf16.msra.mxu0 %v1176_v18 }
  0x9b   :  { %419 = vmatmul.bf16.vlgmr.msrb.gmra.mxu0 %v1384_v43 }
  0x9d   :  { %759 = vmatpush.bf16.msra.mxu0 %v1175_v20 }
  0xa1   :  { %760 = vmatpush.bf16.msra.mxu0 %v1174_v21 }
  0xa5   :  { %v257_v15 = vpop.f32.mrf.mxu2  ;;  %761 = vmatpush.bf16.msra.mxu0 %v1173_v26 }
  0xa9   :  { %762 = vmatpush.bf16.msra.mxu0 %v1172_v29 }
  0xad   :  { %v259_v19 = vpop.f32.mrf.mxu2 }
 0x108   :  { %v103_v27 = vpop.f32.mrf.mxu0 }
 0x109   :  { %v120_v36 = vmul.f32 %v113_v24, %v103_v27  ;;  %v1164_v24 = vld [vmem:[%s1567_s13] sm:$0xff]  ;;  %v1186_v27 = vld [vmem:[%s1571_s14 + $0x30] sm:$0xff] }
 0x10a   :  { %596 = vmatpush.bf16.msrb.mxu2 %v1164_v24 }
 0x10d   :  { %597 = vmatmul.bf16.vlgmr.msrb.gmra.mxu2 %v1384_v43 }
 0x110   :  { %v105_v35 = vpop.f32.mrf.mxu0 }
 0x111   :  { %v121_v37 = vmul.f32 %v118_v34, %v105_v35  ;;  %v1181_v34 = vld [vmem:[%s1571_s14 + $0x8] sm:$0xff]  ;;  %v1180_v35 = vld [vmem:[%s1571_s14] sm:$0xff] }
 0x113   :  { %v134_v41 = vpack.c.bf16 %v121_v37, %v120_v36  ;;  %v1194_v37 = vld [vmem:[%s1564_s8] ss:$0 sm:$0xff] }
 0x115   :  { %146 = vmatpush.bf16.msra.mxu1 %v134_v41 }
 0x118   :  { %865 = vmatmul.msk.bf16.vlgmr.msra.gmra.mxu1 %vm135_vm5, %v132_v42  ;;  %v420_v36 = vpop.f32.mrf.mxu0 }
 0x119   :  { %472 = vmatpush.bf16.msrb.mxu1 %v1147_v47 }
 0x11d   :  { %473 = vmatpush.bf16.msrb.mxu1 %v1146_v49 }
 0x120   :  { %v422_v44 = vpop.f32.mrf.mxu0 }
 0x121   :  { %474 = vmatpush.bf16.msrb.mxu1 %v1145_v54 }
 0x125   :  { %475 = vmatpush.bf16.msrb.mxu1 %v1144_v58 }
 0x129   :  { %476 = vmatpush.bf16.msrb.mxu1 %v1143_v62 }
 0x12d   :  { %477 = vmatpush.bf16.msrb.mxu1 %v1142_v2 }
 0x131   :  { %478 = vmatpush.bf16.msrb.mxu1 %v1141_v8  ;;  %v1198_v8 = vld [vmem:[%s1574_s18] ss:$0 sm:$0xff] }
 0x135   :  { %479 = vmatpush.bf16.msrb.mxu1 %v1140_v22 }
 0x139   :  { %836 = vmatpush.bf16.msra.mxu1 %v1187_v23 }
 0x13d   :  { %837 = vmatpush.bf16.msra.mxu1 %v1186_v27 }
 0x141   :  { %838 = vmatpush.bf16.msra.mxu1 %v1185_v30 }
 0x145   :  { %839 = vmatpush.bf16.msra.mxu1 %v1184_v31 }
 0x149   :  { %840 = vmatpush.bf16.msra.mxu1 %v1183_v32 }
 0x14d   :  { %841 = vmatpush.bf16.msra.mxu1 %v1182_v33 }
 0x151   :  { %842 = vmatpush.bf16.msra.mxu1 %v1181_v34 }
 0x155   :  { %843 = vmatpush.bf16.msra.mxu1 %v1180_v35 }
 0x190   :  { %v598_v48 = vpop.f32.mrf.mxu2 }
 0x195   :  { %v148_v7 = vpop.f32.mrf.mxu1 }
 0x196   :  { %v165_v10 = vmul.f32 %v163_v4, %v148_v7 }
 0x198   :  { %v182_v12 = vpack.c.bf16 %v165_v10, %v165_v10  ;;  %v600_v49 = vpop.f32.mrf.mxu2 }
 0x19a   :  { %317 = vmatmul.bf16.vlgmr.msra.gmra.mxu3 %v182_v12 }
 0x19d   :  { %v150_v16 = vpop.f32.mrf.mxu1 }
 0x21d   :  { %v318_v38 = vpop.f32.mrf.mxu3 }
 0x21e   :  { %v319_v39 = vadd.f32 %v318_v38, %v257_v15 }
 0x220   :  { %v326_v41 = vadd.f32 %v1194_v37, %v319_v39 }
 0x222   :  { %v328_v42 = vmul.f32 0.01, %v326_v41  ;;  %vm327_vm6 = vcmp.gt.f32.partialorder %v326_v41, 0.0 }
 0x224   :  { %v329_v45 = vsel %vm327_vm6, %v326_v41, %v328_v42 }
 0x225   :  { %v320_v46 = vpop.f32.mrf.mxu3  ;;  %v346_v47 = vpack.c.bf16 %v329_v45, %v329_v45 }
 0x227   :  { %480 = vmatmul.bf16.vlgmr.msrb.gmra.mxu1 %v346_v47  ;;  %658 = vmatmul.bf16.vlgmr.msrb.gmra.mxu3 %v346_v47 }
 0x228   :  { %763 = vmatmul.bf16.vlgmr.msra.gmra.mxu0 %v346_v47 }
 0x237   :  { %844 = vmatmul.bf16.vlgmr.msra.gmra.mxu1 %v1384_v43 }
 0x2a4   :  { %v481_v51 = vpop.f32.mrf.mxu1 }
 0x2a5   :  { %v482_v52 = vadd.f32 %v481_v51, %v420_v36  ;;  %v764_v53 = vpop.f32.mrf.mxu0 }
 0x2a6   :  { %v765_v20 = vadd.f32 %v1196_v13, %v764_v53 }
 0x2a7   :  { %v489_v54 = vadd.f32 %v1195_v50, %v482_v52 }
 0x2a9   :  { %v994_v55 = vmul.f32 -1.442695, %v489_v54 }
 0x2aa   :  { %v659_v57 = vpop.f32.mrf.mxu3 }
 0x2ab   :  { %1199 = vpow2.f32 %v994_v55  ;;  %v660_v58 = vadd.f32 %v659_v57, %v598_v48 }
 0x2ac   :  { %v483_v59 = vpop.f32.mrf.mxu1 }
 0x2ad   :  { %v667_v43 = vadd.f32 %v1197_v56, %v660_v58  ;;  %v766_v60 = vpop.f32.mrf.mxu0 }
 0x2af   :  { %v1059_v61 = vmul.f32 -1.442695, %v667_v43 }
 0x2b1   :  { %v1200_v62 = vpop.eup %1199  ;;  %1201 = vpow2.f32 %v1059_v61 }
 0x2b2   :  { %v493_v63 = vadd.f32 1.0, %v1200_v62  ;;  %v661_v0 = vpop.f32.mrf.mxu3 }
 0x2b4   :  { %1203 = vrcp.f32 %v493_v63  ;;  %v845_v1 = vpop.f32.mrf.mxu1  ;;  %v505_v9 = vand.u32 2147483648, %v493_v63  ;;  %v503_v11 = vand.u32 2147483647, %v493_v63  ;;  %vm499_vm8 = vweird.f32 %v493_v63 }
 0x2b5   :  { %v846_v16 = vadd.f32 %v1198_v8, %v845_v1 }
 0x2b6   :  { %v506_v17 = vor.u32 1.1754944e-38, %v505_v9  ;;  %vm504_vm10 = vcmp.eq.f32.partialorder %v503_v11, 8.507059e+37 }
 0x2b7   :  { %v1202_v2 = vpop.eup %1201 }
 0x2b8   :  { %v671_v3 = vadd.f32 1.0, %v1202_v2 }
 0x2ba   :  { %v1204_v4 = vpop.eup %1203  ;;  %1205 = vrcp.f32 %v671_v3  ;;  %v683_v23 = vand.u32 2147483648, %v671_v3  ;;  %v681_v25 = vand.u32 2147483647, %v671_v3  ;;  %vm677_vm12 = vweird.f32 %v671_v3 }
 0x2bb   :  { %v495_v5 = vmul.f32 %v1204_v4, %v493_v63  ;;  %vm500_vm7 = vweird.f32 %v1204_v4 }
 0x2bc   :  { %v847_v6 = vpop.f32.mrf.mxu1  ;;  %vm501_vm9 = vmor %vm499_vm8, %vm500_vm7  ;;  %v684_v28 = vor.u32 1.1754944e-38, %v683_v23  ;;  %vm682_vm14 = vcmp.eq.f32.partialorder %v681_v25, 8.507059e+37 }
 0x2bd   :  { %v496_v7 = vsub.f32 1.0, %v495_v5 }
 0x2bf   :  { %v497_v10 = vmul.f32 %v1204_v4, %v496_v7 }
 0x2c0   :  { %v1206_v12 = vpop.eup %1205 }
 0x2c1   :  { %v673_v14 = vmul.f32 %v1206_v12, %v671_v3  ;;  %v498_v15 = vadd.f32 %v1204_v4, %v497_v10  ;;  %vm678_vm11 = vweird.f32 %v1206_v12 }
 0x2c2   :  { %vm679_vm13 = vmor %vm677_vm12, %vm678_vm11 }
 0x2c3   :  { %v674_v18 = vsub.f32 1.0, %v673_v14  ;;  %v502_v19 = vsel %vm501_vm9, %v1204_v4, %v498_v15 }
 0x2c4   :  { %v507_v21 = vsel %vm504_vm10, %v506_v17, %v502_v19 }
 0x2c5   :  { %v675_v22 = vmul.f32 %v1206_v12, %v674_v18  ;;  %v849_v24 = vmul.f32 %v846_v16, %v507_v21 }
 0x2c7   :  { %v676_v26 = vadd.f32 %v1206_v12, %v675_v22  ;;  %v850_v27 = vadd.f32 %v849_v24, %v765_v20 }
 0x2c9   :  { %v680_v29 = vsel %vm679_vm13, %v1206_v12, %v676_v26  ;;  %1207 = vtanh.f32 %v850_v27 }
 0x2ca   :  { %v685_v30 = vsel %vm682_vm14, %v684_v28, %v680_v29 }
 0x2cb   :  { %v852_v31 = vsub.f32 1.0, %v685_v30  ;;  %v854_v34 = vmul.f32 %v685_v30, %v1380_v40 }
 0x2cf   :  { %v1208_v32 = vpop.eup %1207 }
 0x2d0   :  { %v853_v33 = vmul.f32 %v1208_v32, %v852_v31 }
 0x2d2   :  { %v855_v35 = vadd.f32 %v854_v34, %v853_v33 }
 0x2d4   :  { %856 = vst [vmem:[%s1575_s19] sm:$0xff] %v855_v35 }

</bundles_post_ra>
